<compile_context>
chip_gen: v7x
topology: tpu7x:2x2x1
jax: 0.10.0
libtpu: 0.0.40
codegen_flags: <defaults>
</compile_context>

<pallas_src>
import functools

import numpy as np
import jax
import jax.numpy as jnp
from jax import lax
from jax.experimental import pallas as pl
from jax.experimental.pallas import tpu as pltpu


def _round_up(x, m):
    return (x + m - 1) // m * m


# -----------------------------------------------------------------------------
# Kernel: one (batch, lane-tile) grid step fuses conv1(+mix,+relu),
# conv2(+mix,+relu), the 1x1 downsample residual and the final relu.
# The time axis runs sequentially; xw_ref / hw_ref carry the `pad` columns of
# dilated history from one tile to the next (zeroed at l == 0).
# -----------------------------------------------------------------------------
def _tru_kernel(x_ref, w1_ref, b1_ref, wc_ref, bc_ref, o_ref,
                xw_ref, hw_ref, s1_ref, s2_ref, *,
                K, dil, pad, pada, fuse_res):
    cin = x_ref.shape[1]
    cout = o_ref.shape[1]
    tl = o_ref.shape[2]
    cdt = s1_ref.dtype

    # ---- reset the sequence carries at the start of every batch row ----------
    # (t < 0 is zero-padded, exactly Conv1d's left padding + Chomp1d semantics)
    if pad:
        @pl.when(pl.program_id(1) == 0)
        def _():
            xw_ref[:, :pada] = jnp.zeros((cin, pada), cdt)
            hw_ref[:, :pada] = jnp.zeros((cout, pada), cdt)

    # ---- current x tile, cast to bf16 once ------------------------------------
    xb = x_ref[0].astype(cdt)                                   # (Cin, TL)

    # ---- layer-1 im2col: stage the K dilated taps of x ------------------------
    if pad:
        xw_ref[:, pada:] = xb                                   # lane-aligned write
        for m in range(K):
            s = pada - dil * m                                  # static offsets
            s1_ref[m * cin:(m + 1) * cin, :] = xw_ref[:, s:s + tl]
        # carry x[t0+TL-pad : t0+TL] into the halo region for the next tile
        xw_ref[:, pada - pad:pada] = xw_ref[:, pada + tl - pad:pada + tl]
    else:
        s1_ref[...] = xb

    # ---- layer 1: folded (conv1 / conv1_b / conv1_linear) = ONE matmul --------
    h = jnp.maximum(
        jnp.dot(w1_ref[...], s1_ref[...], preferred_element_type=jnp.float32)
        + b1_ref[...], 0.0)                                     # (Cout, TL) f32
    hb = h.astype(cdt)                                          # cast once

    # ---- layer-2 im2col: K dilated taps of h + the residual x rows ------------
    if pad:
        hw_ref[:, pada:] = hb
        for m in range(K):
            s = pada - dil * m
            s2_ref[m * cout:(m + 1) * cout, :] = hw_ref[:, s:s + tl]
        hw_ref[:, pada - pad:pada] = hw_ref[:, pada + tl - pad:pada + tl]
    else:
        s2_ref[0:cout, :] = hb
    s2_ref[K * cout:, :] = xb                                   # residual input rows

    # ---- layer 2 (+ fused 1x1 downsample residual) -----------------------------
    if fuse_res:
        # single MXU pass: rows [:Cout] = folded conv2, rows [Cout:] = downsample
        acc = (jnp.dot(wc_ref[...], s2_ref[...], preferred_element_type=jnp.float32)
               + bc_ref[...])                                   # (2*Cout, TL)
        y2 = jnp.maximum(acc[:cout], 0.0)                       # relu2 BEFORE the add
        res = acc[cout:]
    else:
        y2 = jnp.maximum(
            jnp.dot(wc_ref[0:cout, 0:K * cout], s2_ref[0:K * cout, :],
                    preferred_element_type=jnp.float32) + bc_ref[0:cout], 0.0)
        res = (jnp.dot(wc_ref[cout:, K * cout:], s2_ref[K * cout:, :],
                       preferred_element_type=jnp.float32) + bc_ref[cout:])

    o_ref[0] = jnp.maximum(y2 + res, 0.0).astype(o_ref.dtype)


# -----------------------------------------------------------------------------
# Host-side exact algebra: fold the 1x1 bidirectional mixes into per-tap conv
# weights and lay the taps out along the contraction dimension.
# -----------------------------------------------------------------------------
def _fold_params(params):
    cout = params["w1f"].shape[0]
    p1f, p1b = params["p1"][:, :cout], params["p1"][:, cout:]
    p2f, p2b = params["p2"][:, :cout], params["p2"][:, cout:]
    # Folded tap m has lag dil*m: pairs forward tap K-1-m with backward tap m.
    w1e = (jnp.einsum("oc,cim->oim", p1f, params["w1f"][:, :, ::-1])
           + jnp.einsum("oc,cim->oim", p1b, params["w1b"]))
    w2e = (jnp.einsum("oc,cim->oim", p2f, params["w2f"][:, :, ::-1])
           + jnp.einsum("oc,cim->oim", p2b, params["w2b"]))
    b1e = p1f @ params["b1f"] + p1b @ params["b1b"] + params["pb1"]
    b2e = p2f @ params["b2f"] + p2b @ params["b2b"] + params["pb2"]
    # (Cout, Cin, K) -> (Cout, K*Cin): column block m holds tap m (lag dil*m).
    w1s = jnp.transpose(w1e, (0, 2, 1)).reshape(cout, -1)
    w2s = jnp.transpose(w2e, (0, 2, 1)).reshape(cout, -1)
    return w1s, b1e, w2s, b2e


def temporal_residual_unit(x, params, *, kernel_size, dilation, padding,
                           lane_tile=512, compute_dtype=jnp.bfloat16,
                           out_dtype=jnp.float32):
    """x: (B, Cin, L) float32 -> (B, Cout, L) out_dtype.

    lane_tile: lane (time) tile, multiple of 128.  ~1024 is good on v6e,
    ~512 on v5e/v7x (v7x has half the VMEM).  Pass out_dtype=jnp.bfloat16 when
    the consumer is another TCN layer to halve output HBM traffic.
    """
    B, Cin, L = x.shape
    K, dil, pad = kernel_size, dilation, padding
    Cout = params["w1f"].shape[0]
    assert pad == dil * (K - 1), "TCN convention: padding = dilation*(kernel_size-1)"

    # ---- host-side exact prep: fold 1x1 mixes + downsample, bf16 cast ---------
    w1s, b1e, w2s, b2e = _fold_params(params)
    # Combined layer-2 weight: extra OUTPUT rows for the residual (relu2 happens
    # before the residual add, so contraction-folding would be wrong).
    wc = jnp.zeros((2 * Cout, K * Cout + Cin), jnp.float32)
    wc = wc.at[:Cout, :K * Cout].set(w2s)
    wc = wc.at[Cout:, K * Cout:].set(params["wd"])
    bc = jnp.concatenate([b2e, params["bd"]], axis=0)

    w1s = w1s.astype(compute_dtype)
    wc = wc.astype(compute_dtype)
    b1e = b1e.astype(jnp.float32)
    bc = bc.astype(jnp.float32)

    # ---- lane tiling: TL multiple of 128; ragged last tile handled by Pallas --
    TL = min(lane_tile, _round_up(L, 128))
    TL = max(128, (TL // 128) * 128)
    NT = pl.cdiv(L, TL)
    PADA = _round_up(pad, 128) if pad else 0            # 128-aligned carry region
    fuse_res = (2 * Cout) <= 128                        # small channels: one MXU pass

    # ---- VMEM budget with generation-aware cap ---------------------------------
    out_isz = jnp.dtype(out_dtype).itemsize
    c_isz = jnp.dtype(compute_dtype).itemsize
    weight_bytes = sum(int(np.prod(a.shape)) * jnp.dtype(a.dtype).itemsize
                       for a in (w1s, b1e, wc, bc))
    est = (2 * Cin * TL * x.dtype.itemsize              # double-buffered x block
           + 2 * Cout * TL * out_isz                    # double-buffered out block
           + (Cin + Cout) * (PADA + TL) * c_isz         # carry windows
           + (K * Cin + K * Cout + Cin) * TL * c_isz    # im2col staging
           + 2 * weight_bytes                           # resident weights (x2 safety)
           + 6 * Cout * TL * 4)                         # f32 temporaries
    try:
        cap = int(pltpu.get_tpu_info().vmem_capacity_bytes) * 3 // 4
    except Exception:
        cap = 48 * 1024 * 1024                          # safe on every generation
    cap = min(cap, 100 * 1024 * 1024)                   # ~100 MiB max on 128 MiB parts
    vmem_limit = int(min(max(4 * est, 16 * 1024 * 1024), cap))

    weights = (w1s, b1e, wc, bc)

    def _const_spec(a):
        nd = a.ndim
        return pl.BlockSpec(a.shape, lambda b, l, nd=nd: (0,) * nd)

    kern = functools.partial(_tru_kernel, K=K, dil=dil, pad=pad, pada=PADA,
                             fuse_res=fuse_res)
    return pl.pallas_call(
        kern,
        out_shape=jax.ShapeDtypeStruct((B, Cout, L), out_dtype),
        grid_spec=pltpu.PrefetchScalarGridSpec(
            num_scalar_prefetch=0,
            grid=(B, NT),
            in_specs=[pl.BlockSpec((1, Cin, TL), lambda b, l: (b, 0, l))]
                     + [_const_spec(w) for w in weights],
            out_specs=pl.BlockSpec((1, Cout, TL), lambda b, l: (b, 0, l)),
            scratch_shapes=[
                pltpu.VMEM((Cin, PADA + TL), compute_dtype),       # x window + carry
                pltpu.VMEM((Cout, PADA + TL), compute_dtype),      # h window + carry
                pltpu.VMEM((K * Cin, TL), compute_dtype),          # layer-1 im2col
                pltpu.VMEM((K * Cout + Cin, TL), compute_dtype),   # layer-2 im2col + x
            ]),
        compiler_params=pltpu.CompilerParams(
            # batch is parallel (v7x megacore); the time axis carries the x/h
            # history in scratch so it must run sequentially.
            dimension_semantics=("parallel", "arbitrary"),
            vmem_limit_bytes=vmem_limit),
    )(x, *weights)


# -----------------------------------------------------------------------------
# References.
# -----------------------------------------------------------------------------
def reference_forward(x, params, *, kernel_size, dilation, padding):
    """Literal PyTorch-equivalent forward (f32, highest matmul precision)."""
    p, d = padding, dilation
    hi = lax.Precision.HIGHEST

    def conv1d(inp, w, b):
        out = lax.conv_general_dilated(
            inp, w, window_strides=(1,), padding=[(p, p)], rhs_dilation=(d,),
            dimension_numbers=("NCH", "OIH", "NCH"), precision=hi)
        return out + b.reshape(1, -1, 1)

    def pw(inp, w, b):
        return jnp.einsum("oc,bcl->bol", w, inp, precision=hi) + b.reshape(1, -1, 1)

    out = conv1d(x, params["w1f"], params["b1f"])
    out_b = conv1d(x[:, :, ::-1], params["w1b"], params["b1b"])[:, :, ::-1]
    out = pw(jnp.concatenate([out, out_b], axis=1), params["p1"], params["pb1"])
    out = jax.nn.relu(out[:, :, :-p])                          # chomp1 + relu1
    out_f = conv1d(out, params["w2f"], params["b2f"])
    out_b = conv1d(out[:, :, ::-1], params["w2b"], params["b2b"])[:, :, ::-1]
    out_f = pw(jnp.concatenate([out_f, out_b], axis=1), params["p2"], params["pb2"])
    out2 = jax.nn.relu(out_f[:, :, :-p])                       # chomp2 + relu2
    res = pw(x, params["wd"], params["bd"])                    # downsample
    return jax.nn.relu(out2 + res)


def folded_bf16_reference(x, params, *, kernel_size, dilation,
                          compute_dtype=jnp.bfloat16):
    """Pure-JAX replica of the kernel's exact math (folded weights, bf16 MXU
    operands, f32 accumulation) -> tight Pallas-correctness check."""
    K, d = kernel_size, dilation
    B, Cin, L = x.shape
    Cout = params["w1f"].shape[0]
    hi = lax.Precision.HIGHEST
    f32 = jnp.float32

    w1s, b1e, w2s, b2e = _fold_params(params)
    w1 = w1s.astype(compute_dtype).astype(f32).reshape(Cout, K, Cin)
    w2 = w2s.astype(compute_dtype).astype(f32).reshape(Cout, K, Cout)
    wd = params["wd"].astype(compute_dtype).astype(f32)
    xq = x.astype(compute_dtype).astype(f32)

    def causal(h, w, b):
        pp = d * (K - 1)
        hp = jnp.pad(h, ((0, 0), (0, 0), (pp, 0)))
        out = jnp.broadcast_to(b.reshape(1, -1, 1), (B, Cout, L)).astype(f32)
        for m in range(K):
            sl = hp[:, :, pp - d * m: pp - d * m + L]
            out = out + jnp.einsum("oc,bcl->bol", w[:, m], sl, precision=hi)
        return out

    h = jax.nn.relu(causal(xq, w1, b1e))
    hq = h.astype(compute_dtype).astype(f32)
    out2 = jax.nn.relu(causal(hq, w2, b2e))
    res = jnp.einsum("oc,bcl->bol", wd, xq, precision=hi) + params["bd"].reshape(1, -1, 1)
    return jax.nn.relu(out2 + res)


if __name__ == "__main__":
    def make_params(keys, Cin, Cout, K):
        def nrm(k, shape, scale):
            return (scale * jax.random.normal(k, shape)).astype(jnp.float32)
        # Effective (post weight-norm) parameters, deterministically initialized.
        return {
            "w1f": nrm(keys[0], (Cout, Cin, K), (2.0 / (Cout * K)) ** 0.5),
            "b1f": nrm(keys[1], (Cout, 1), 0.05),
            "w1b": nrm(keys[2], (Cout, Cin, K), (2.0 / (Cout * K)) ** 0.5),
            "b1b": nrm(keys[3], (Cout, 1), 0.05),
            "p1":  nrm(keys[4], (Cout, 2 * Cout), (1.0 / (2 * Cout)) ** 0.5),
            "pb1": nrm(keys[5], (Cout, 1), 0.05),
            "w2f": nrm(keys[6], (Cout, Cout, K), (2.0 / (Cout * K)) ** 0.5),
            "b2f": nrm(keys[7], (Cout, 1), 0.05),
            "w2b": nrm(keys[8], (Cout, Cout, K), (2.0 / (Cout * K)) ** 0.5),
            "b2b": nrm(keys[9], (Cout, 1), 0.05),
            "p2":  nrm(keys[10], (Cout, 2 * Cout), (1.0 / (2 * Cout)) ** 0.5),
            "pb2": nrm(keys[11], (Cout, 1), 0.05),
            "wd":  nrm(keys[12], (Cout, Cin), (2.0 / Cout) ** 0.5),
            "bd":  nrm(keys[13], (Cout, 1), 0.05),
        }

    def run_case(case_id, B, Cin, Cout, L, K, dil):
        pad = dil * (K - 1)
        key = jax.random.fold_in(jax.random.PRNGKey(0), case_id)
        keys = jax.random.split(key, 16)
        params = make_params(keys, Cin, Cout, K)
        x = jax.random.normal(keys[14], (B, Cin, L), dtype=jnp.float32)

        out = temporal_residual_unit(x, params, kernel_size=K, dilation=dil,
                                     padding=pad)
        out = jax.block_until_ready(out)
        assert out.shape == (B, Cout, L)

        # Tight check: same math as the kernel (folded weights, bf16 operands,
        # f32 accumulation) -> catches tap-lag / carry / BlockSpec regressions.
        rep = folded_bf16_reference(x, params, kernel_size=K, dilation=dil)
        np.testing.assert_allclose(np.asarray(out), np.asarray(rep),
                                   rtol=5e-3, atol=5e-3)
        # Semantic check vs the literal f32 module forward; the remaining gap is
        # purely the bf16 quantization of the MXU operands (verified exact above).
        ref = reference_forward(x, params, kernel_size=K, dilation=dil, padding=pad)
        np.testing.assert_allclose(np.asarray(out), np.asarray(ref),
                                   rtol=5e-2, atol=1e-1)

    # Small case matching the module's toy shapes.
    run_case(0, B=2, Cin=4, Cout=8, L=16, K=3, dil=2)
    # Multi-tile case: exercises the cross-tile x/h carries and the ragged
    # (masked) final lane tile (L=300 -> three 128-wide tiles, 44-wide tail).
    run_case(1, B=2, Cin=4, Cout=8, L=300, K=3, dil=3)
    print("KERNEL_OK")
</pallas_src>

<mosaic_0001>
module attributes {stable_mosaic.version = 11 : i64} {
  func.func @_tru_kernel(%arg0: i32, %arg1: i32, %arg2: memref<1x4x128xf32, #tpu.memory_space<vmem>>, %arg3: memref<8x12xbf16, #tpu.memory_space<vmem>>, %arg4: memref<8x1xf32, #tpu.memory_space<vmem>>, %arg5: memref<16x28xbf16, #tpu.memory_space<vmem>>, %arg6: memref<16x1xf32, #tpu.memory_space<vmem>>, %arg7: memref<1x8x128xf32, #tpu.memory_space<vmem>>, %arg8: memref<4x256xbf16, #tpu.memory_space<vmem>>, %arg9: memref<8x256xbf16, #tpu.memory_space<vmem>>, %arg10: memref<12x128xbf16, #tpu.memory_space<vmem>>, %arg11: memref<28x128xbf16, #tpu.memory_space<vmem>>) attributes {dimension_semantics = [#tpu.dimension_semantics<parallel>, #tpu.dimension_semantics<arbitrary>], iteration_bounds = array<i64: 2, 1>, scalar_prefetch = 0 : i64, scratch_operands = 4 : i64, tpu.core_type = #tpu.core_type<tc>, window_params = [{transform_indices = @transform_0, window_bounds = array<i64: 1, 4, 128>}, {pipeline_mode = #tpu.pipeline_mode<synchronous>, transform_indices = @transform_1, window_bounds = array<i64: 8, 12>}, {pipeline_mode = #tpu.pipeline_mode<synchronous>, transform_indices = @transform_2, window_bounds = array<i64: 8, 1>}, {pipeline_mode = #tpu.pipeline_mode<synchronous>, transform_indices = @transform_3, window_bounds = array<i64: 16, 28>}, {pipeline_mode = #tpu.pipeline_mode<synchronous>, transform_indices = @transform_4, window_bounds = array<i64: 16, 1>}, {transform_indices = @transform_5, window_bounds = array<i64: 1, 8, 128>}]} {
    %c0_i32 = arith.constant 0 : i32
    %0 = arith.cmpi eq, %arg1, %c0_i32 : i32
    %1 = arith.extui %0 : i1 to i32
    %c0_i32_0 = arith.constant 0 : i32
    %2 = arith.cmpi ne, %1, %c0_i32_0 : i32
    scf.if %2 {
      %cst_52 = arith.constant 0.000000e+00 : bf16
      %50 = vector.broadcast %cst_52 : bf16 to vector<4x128xbf16>
      %c0_53 = arith.constant 0 : index
      %c0_54 = arith.constant 0 : index
      %51 = vector.load %arg8[%c0_53, %c0_54] : memref<4x256xbf16, #tpu.memory_space<vmem>>, vector<4x128xbf16>
      tpu.vector_store %arg8[%c0_53, %c0_54], %50 {strides = array<i32>} : memref<4x256xbf16, #tpu.memory_space<vmem>>, vector<4x128xbf16>,
      %cst_55 = arith.constant 0.000000e+00 : bf16
      %52 = vector.broadcast %cst_55 : bf16 to vector<8x128xbf16>
      %c0_56 = arith.constant 0 : index
      %c0_57 = arith.constant 0 : index
      %53 = vector.load %arg9[%c0_56, %c0_57] : memref<8x256xbf16, #tpu.memory_space<vmem>>, vector<8x128xbf16>
      tpu.vector_store %arg9[%c0_56, %c0_57], %52 {strides = array<i32>} : memref<8x256xbf16, #tpu.memory_space<vmem>>, vector<8x128xbf16>,
    } else {
    }
    %c0 = arith.constant 0 : index
    %c0_1 = arith.constant 0 : index
    %c0_2 = arith.constant 0 : index
    %3 = vector.load %arg2[%c0, %c0_1, %c0_2] : memref<1x4x128xf32, #tpu.memory_space<vmem>>, vector<1x4x128xf32>
    %4 = vector.shape_cast %3 : vector<1x4x128xf32> to vector<4x128xf32>
    %5 = arith.truncf %4 : vector<4x128xf32> to vector<4x128xbf16>
    %c0_3 = arith.constant 0 : index
    %c128 = arith.constant 128 : index
    %6 = vector.load %arg8[%c0_3, %c128] : memref<4x256xbf16, #tpu.memory_space<vmem>>, vector<4x128xbf16>
    tpu.vector_store %arg8[%c0_3, %c128], %5 {strides = array<i32>} : memref<4x256xbf16, #tpu.memory_space<vmem>>, vector<4x128xbf16>,
    %c0_4 = arith.constant 0 : index
    %c128_5 = arith.constant 128 : index
    %7 = vector.load %arg8[%c0_4, %c128_5] : memref<4x256xbf16, #tpu.memory_space<vmem>>, vector<4x128xbf16>
    %c0_6 = arith.constant 0 : index
    %c0_7 = arith.constant 0 : index
    %8 = vector.load %arg10[%c0_6, %c0_7] : memref<12x128xbf16, #tpu.memory_space<vmem>>, vector<4x128xbf16>
    tpu.vector_store %arg10[%c0_6, %c0_7], %7 {strides = array<i32>} : memref<12x128xbf16, #tpu.memory_space<vmem>>, vector<4x128xbf16>,
    %c0_8 = arith.constant 0 : index
    %c126 = arith.constant 126 : index
    %9 = vector.load %arg8[%c0_8, %c126] : memref<4x256xbf16, #tpu.memory_space<vmem>>, vector<4x128xbf16>
    %c4 = arith.constant 4 : index
    %c0_9 = arith.constant 0 : index
    %10 = vector.load %arg10[%c4, %c0_9] : memref<12x128xbf16, #tpu.memory_space<vmem>>, vector<4x128xbf16>
    tpu.vector_store %arg10[%c4, %c0_9], %9 {strides = array<i32>} : memref<12x128xbf16, #tpu.memory_space<vmem>>, vector<4x128xbf16>,
    %c0_10 = arith.constant 0 : index
    %c124 = arith.constant 124 : index
    %11 = vector.load %arg8[%c0_10, %c124] : memref<4x256xbf16, #tpu.memory_space<vmem>>, vector<4x128xbf16>
    %c8 = arith.constant 8 : index
    %c0_11 = arith.constant 0 : index
    %12 = vector.load %arg10[%c8, %c0_11] : memref<12x128xbf16, #tpu.memory_space<vmem>>, vector<4x128xbf16>
    tpu.vector_store %arg10[%c8, %c0_11], %11 {strides = array<i32>} : memref<12x128xbf16, #tpu.memory_space<vmem>>, vector<4x128xbf16>,
    %c0_12 = arith.constant 0 : index
    %c252 = arith.constant 252 : index
    %13 = vector.load %arg8[%c0_12, %c252] : memref<4x256xbf16, #tpu.memory_space<vmem>>, vector<4x4xbf16>
    %c0_13 = arith.constant 0 : index
    %c124_14 = arith.constant 124 : index
    %14 = vector.load %arg8[%c0_13, %c124_14] : memref<4x256xbf16, #tpu.memory_space<vmem>>, vector<4x4xbf16>
    tpu.vector_store %arg8[%c0_13, %c124_14], %13 {strides = array<i32>} : memref<4x256xbf16, #tpu.memory_space<vmem>>, vector<4x4xbf16>,
    %c0_15 = arith.constant 0 : index
    %c0_16 = arith.constant 0 : index
    %15 = vector.load %arg3[%c0_15, %c0_16] : memref<8x12xbf16, #tpu.memory_space<vmem>>, vector<8x12xbf16>
    %c0_17 = arith.constant 0 : index
    %c0_18 = arith.constant 0 : index
    %16 = vector.load %arg10[%c0_17, %c0_18] : memref<12x128xbf16, #tpu.memory_space<vmem>>, vector<12x128xbf16>
    %cst = arith.constant dense<0.000000e+00> : vector<8x128xf32>
    %17 = tpu.matmul %15, %16, %cst {dimension_numbers = #tpu.dot_dimension_numbers<[1], [0], [0], [1], [0, 0, 1, 1], [], []>} : vector<8x12xbf16>, vector<12x128xbf16>, vector<8x128xf32> -> vector<8x128xf32>
    %c0_19 = arith.constant 0 : index
    %c0_20 = arith.constant 0 : index
    %18 = vector.load %arg4[%c0_19, %c0_20] : memref<8x1xf32, #tpu.memory_space<vmem>>, vector<8x1xf32>
    %19 = vector.broadcast %18 : vector<8x1xf32> to vector<8x128xf32>
    %20 = arith.addf %17, %19 : vector<8x128xf32>
    %cst_21 = arith.constant 0.000000e+00 : f32
    %21 = vector.broadcast %cst_21 : f32 to vector<8x128xf32>
    %22 = arith.maximumf %20, %21 : vector<8x128xf32>
    %23 = arith.truncf %22 : vector<8x128xf32> to vector<8x128xbf16>
    %c0_22 = arith.constant 0 : index
    %c128_23 = arith.constant 128 : index
    %24 = vector.load %arg9[%c0_22, %c128_23] : memref<8x256xbf16, #tpu.memory_space<vmem>>, vector<8x128xbf16>
    tpu.vector_store %arg9[%c0_22, %c128_23], %23 {strides = array<i32>} : memref<8x256xbf16, #tpu.memory_space<vmem>>, vector<8x128xbf16>,
    %c0_24 = arith.constant 0 : index
    %c128_25 = arith.constant 128 : index
    %25 = vector.load %arg9[%c0_24, %c128_25] : memref<8x256xbf16, #tpu.memory_space<vmem>>, vector<8x128xbf16>
    %c0_26 = arith.constant 0 : index
    %c0_27 = arith.constant 0 : index
    %26 = vector.load %arg11[%c0_26, %c0_27] : memref<28x128xbf16, #tpu.memory_space<vmem>>, vector<8x128xbf16>
    tpu.vector_store %arg11[%c0_26, %c0_27], %25 {strides = array<i32>} : memref<28x128xbf16, #tpu.memory_space<vmem>>, vector<8x128xbf16>,
    %c0_28 = arith.constant 0 : index
    %c126_29 = arith.constant 126 : index
    %27 = vector.load %arg9[%c0_28, %c126_29] : memref<8x256xbf16, #tpu.memory_space<vmem>>, vector<8x128xbf16>
    %c8_30 = arith.constant 8 : index
    %c0_31 = arith.constant 0 : index
    %28 = vector.load %arg11[%c8_30, %c0_31] : memref<28x128xbf16, #tpu.memory_space<vmem>>, vector<8x128xbf16>
    tpu.vector_store %arg11[%c8_30, %c0_31], %27 {strides = array<i32>} : memref<28x128xbf16, #tpu.memory_space<vmem>>, vector<8x128xbf16>,
    %c0_32 = arith.constant 0 : index
    %c124_33 = arith.constant 124 : index
    %29 = vector.load %arg9[%c0_32, %c124_33] : memref<8x256xbf16, #tpu.memory_space<vmem>>, vector<8x128xbf16>
    %c16 = arith.constant 16 : index
    %c0_34 = arith.constant 0 : index
    %30 = vector.load %arg11[%c16, %c0_34] : memref<28x128xbf16, #tpu.memory_space<vmem>>, vector<8x128xbf16>
    tpu.vector_store %arg11[%c16, %c0_34], %29 {strides = array<i32>} : memref<28x128xbf16, #tpu.memory_space<vmem>>, vector<8x128xbf16>,
    %c0_35 = arith.constant 0 : index
    %c252_36 = arith.constant 252 : index
    %31 = vector.load %arg9[%c0_35, %c252_36] : memref<8x256xbf16, #tpu.memory_space<vmem>>, vector<8x4xbf16>
    %c0_37 = arith.constant 0 : index
    %c124_38 = arith.constant 124 : index
    %32 = vector.load %arg9[%c0_37, %c124_38] : memref<8x256xbf16, #tpu.memory_space<vmem>>, vector<8x4xbf16>
    tpu.vector_store %arg9[%c0_37, %c124_38], %31 {strides = array<i32>} : memref<8x256xbf16, #tpu.memory_space<vmem>>, vector<8x4xbf16>,
    %c24 = arith.constant 24 : index
    %c0_39 = arith.constant 0 : index
    %33 = vector.load %arg11[%c24, %c0_39] : memref<28x128xbf16, #tpu.memory_space<vmem>>, vector<4x128xbf16>
    tpu.vector_store %arg11[%c24, %c0_39], %5 {strides = array<i32>} : memref<28x128xbf16, #tpu.memory_space<vmem>>, vector<4x128xbf16>,
    %c0_40 = arith.constant 0 : index
    %c0_41 = arith.constant 0 : index
    %34 = vector.load %arg5[%c0_40, %c0_41] : memref<16x28xbf16, #tpu.memory_space<vmem>>, vector<16x28xbf16>
    %c0_42 = arith.constant 0 : index
    %c0_43 = arith.constant 0 : index
    %35 = vector.load %arg11[%c0_42, %c0_43] : memref<28x128xbf16, #tpu.memory_space<vmem>>, vector<28x128xbf16>
    %cst_44 = arith.constant dense<0.000000e+00> : vector<16x128xf32>
    %36 = tpu.matmul %34, %35, %cst_44 {dimension_numbers = #tpu.dot_dimension_numbers<[1], [0], [0], [1], [0, 0, 1, 1], [], []>} : vector<16x28xbf16>, vector<28x128xbf16>, vector<16x128xf32> -> vector<16x128xf32>
    %c0_45 = arith.constant 0 : index
    %c0_46 = arith.constant 0 : index
    %37 = vector.load %arg6[%c0_45, %c0_46] : memref<16x1xf32, #tpu.memory_space<vmem>>, vector<16x1xf32>
    %38 = vector.broadcast %37 : vector<16x1xf32> to vector<16x128xf32>
    %39 = arith.addf %36, %38 : vector<16x128xf32>
    %40 = vector.extract_strided_slice %39 {offsets = [0, 0], sizes = [8, 128], strides = [1, 1]} : vector<16x128xf32> to vector<8x128xf32>
    %cst_47 = arith.constant 0.000000e+00 : f32
    %41 = vector.broadcast %cst_47 : f32 to vector<8x128xf32>
    %42 = arith.maximumf %40, %41 : vector<8x128xf32>
    %43 = vector.extract_strided_slice %39 {offsets = [8, 0], sizes = [8, 128], strides = [1, 1]} : vector<16x128xf32> to vector<8x128xf32>
    %44 = arith.addf %42, %43 : vector<8x128xf32>
    %cst_48 = arith.constant 0.000000e+00 : f32
    %45 = vector.broadcast %cst_48 : f32 to vector<8x128xf32>
    %46 = arith.maximumf %44, %45 : vector<8x128xf32>
    %c0_49 = arith.constant 0 : index
    %c0_50 = arith.constant 0 : index
    %c0_51 = arith.constant 0 : index
    %47 = vector.load %arg7[%c0_49, %c0_50, %c0_51] : memref<1x8x128xf32, #tpu.memory_space<vmem>>, vector<1x8x128xf32>
    %48 = vector.shape_cast %47 : vector<1x8x128xf32> to vector<8x128xf32>
    %49 = vector.shape_cast %46 : vector<8x128xf32> to vector<1x8x128xf32>
    tpu.vector_store %arg7[%c0_49, %c0_50, %c0_51], %49 {strides = array<i32>} : memref<1x8x128xf32, #tpu.memory_space<vmem>>, vector<1x8x128xf32>,
    return
  }
  func.func @transform_0(%arg0: i32, %arg1: i32) -> (i32, i32, i32) {
    %c0_i32 = arith.constant 0 : i32
    %c0_i32_0 = arith.constant 0 : i32
    return %arg0, %c0_i32, %arg1 : i32, i32, i32
  }
  func.func @transform_1(%arg0: i32, %arg1: i32) -> (i32, i32) {
    %c0_i32 = arith.constant 0 : i32
    %c0_i32_0 = arith.constant 0 : i32
    %c0_i32_1 = arith.constant 0 : i32
    return %c0_i32, %c0_i32_0 : i32, i32
  }
  func.func @transform_2(%arg0: i32, %arg1: i32) -> (i32, i32) {
    %c0_i32 = arith.constant 0 : i32
    %c0_i32_0 = arith.constant 0 : i32
    %c0_i32_1 = arith.constant 0 : i32
    return %c0_i32, %c0_i32_0 : i32, i32
  }
  func.func @transform_3(%arg0: i32, %arg1: i32) -> (i32, i32) {
    %c0_i32 = arith.constant 0 : i32
    %c0_i32_0 = arith.constant 0 : i32
    %c0_i32_1 = arith.constant 0 : i32
    return %c0_i32, %c0_i32_0 : i32, i32
  }
  func.func @transform_4(%arg0: i32, %arg1: i32) -> (i32, i32) {
    %c0_i32 = arith.constant 0 : i32
    %c0_i32_0 = arith.constant 0 : i32
    %c0_i32_1 = arith.constant 0 : i32
    return %c0_i32, %c0_i32_0 : i32, i32
  }
  func.func @transform_5(%arg0: i32, %arg1: i32) -> (i32, i32, i32) {
    %c0_i32 = arith.constant 0 : i32
    %c0_i32_0 = arith.constant 0 : i32
    return %arg0, %c0_i32, %arg1 : i32, i32, i32
  }
}

</mosaic_0001>

<bundles_post_ra>
// kernel: tpu_custom_call.1
= control target key start
LH: loop header
LB: loop body
LE: loop exit
PB: predicated region body
PF: predicated region fallthrough
CT: control target
= control target key end

     0   :  { %10 = vsyncpa [#allocation7], 0  ;;  %s916_s0 = inlined_call_operand.vmem [shape: f32[2,4,16], index: 0, kind: input, shape index: {}]   ;;  %s917_s1 = inlined_call_operand.vmem [shape: bf16[8,12], index: 1, kind: input, shape index: {}]   ;;  %s918_s2 = inlined_call_operand.vmem [shape: f32[8,1], index: 2, kind: input, shape index: {}]   ;;  %s919_s3 = inlined_call_operand.vmem [shape: bf16[16,28], index: 3, kind: input, shape index: {}]   ;;  %s920_s4 = inlined_call_operand.vmem [shape: f32[16,1], index: 4, kind: input, shape index: {}]   ;;  %s921_s5 = inlined_call_operand.hbm [shape: f32[2,8,16], index: 5, kind: output, shape index: {}]  }
   0x1   :  { %12 = vsyncpa [#allocation7 + $0x1], 0  ;;  %s774_s18 = smov 0   ;;  %s776_s19 = smov 0  }
   0x2   :  { %s778_s20 = smov 0   ;;  %s780_s21 = smov 0  }
   0x3   :  { %s782_s22 = smov 0   ;;  %s784_s23 = smov 0  }
   0x4 LB: > { %s552_s24 = sadd.s32 4294967295, %s735_s23   ;;  %s553_s25 = sadd.s32 4294967294, %s735_s23   ;;  %s735_s23 = sphi %s784_s23, %s18_s23   ;;  %s731_s22 = sphi %s782_s22, %s928_s22   ;;  %s727_s21 = sphi %s780_s21, %s927_s21   ;;  %s723_s20 = sphi %s778_s20, %s926_s20   ;;  %s719_s19 = sphi %s776_s19, %s925_s19   ;;  %s715_s18 = sphi %s774_s18, %s924_s18  }
   0x5   : > { %s30_s26 = sadd.s32 1, %s731_s22  ;;  %s151_s27 = sadd.s32 1, %s723_s20 }
   0x6   : > { %p32_p0 = scmp.ge.s32.totalorder %s30_s26, 2  ;;  %p161_p1 = scmp.ne.s32.totalorder %s723_s20, %s719_s19 }
   0x7   : > { %p162_p2 = scmp.eq.s32.totalorder %s552_s24, 1  ;;  %p167_p3 = scmp.ne.s32.totalorder %s719_s19, %s715_s18 }
   0x8   : > { %s930_s26 = smov (%p32_p0, %s30_s26), 0  ;;  %p168_p5 = scmp.eq.s32.totalorder %s553_s25, 1 }
   0x9   : > { %p814_p4 = por %p162_p2, %p161_p1  ;;  %s146_s29 = ssub.s32 %s731_s22, %s930_s26 }
   0xa   : > { %p556_p6 = scmp.ge.s32.totalorder %s735_s23, 1  ;;  %p149_p7 = scmp.eq.s32.totalorder %s146_s29, 0 }
   0xb   : > { %p821_p8 = por %p168_p5, %p167_p3  ;;  %p208_p9 = scmp.lt.s32.totalorder %s735_s23, 3 }
   0xc   : > { %s827_s6 = scalar_select %p149_p7, %s723_s20, %s151_s27  }
   0xd   : > { %p209_p10 = pnand %p556_p6, %p208_p9 }
   0xe   : > { %p238_p11 = scmp.lt.s32.totalorder (!%p209_p10), %s727_s21, 1  ;;  %v737_v0 = vmov (!%p209_p10), 0   ;;  %v738_v2 = vmov (!%p209_p10), 1983009808   ;;  %v263_v4 = vlaneseq (!%p209_p10)  ;;  %vm291_vm0 = vcmask (!%p209_p10), 1042400   ;;  %s740_s12 = smov (!%p209_p10), 2  }
   0xf   : > { %212 = sbr.rel (%p209_p10) target bundleno = 762 (0x2fa), region = 40  ;;  %250 = vst [vmem:[#allocation2] sm:$0x3] (!%p209_p10), %v737_v0  ;;  %251 = vst [vmem:[#allocation3] sm:$0xf] (!%p209_p10), %v737_v0  ;;  %650 = vset.pattern.permute.xlu1 (!%p209_p10), %v737_v0  ;;  %651 = vset.pattern.permute.xlu0 (!%p209_p10), %v737_v0  ;;  %v261_v3 = vunpack.c.l.s4 (!%p209_p10), %v738_v2  ;;  %v739_v9 = vmov (!%p209_p10), 0.0  }
  0x10   : > { %v264_v7 = vshrl.u32 (!%p209_p10), %v263_v4, 7  ;;  %575 = vmatprep.subr.bf16.mxu0 (!%p209_p10), %v739_v9  ;;  %581 = vmatprep.subr.bf16.mxu1 (!%p209_p10), %v739_v9  ;;  %s741_s13 = smov (!%p209_p10), 4   ;;  %vm742_vm1 = vmmov (!%p209_p10), 0   ;;  %v296_v15 = vld [vmem:[%s918_s2] sm:$0xff] (!%p209_p10)  ;;  %vm270_vm2 = vcmask (!%p209_p10), 15360   ;;  %vm286_vm3 = vcmask (!%p209_p10), 31744  }
  0x11   : > { %v262_v6 = vunpack.c.0.s8 (!%p209_p10), %v261_v3  ;;  %577 = vmatprep.mubr.msk.bf16.mxu0 (!%p209_p10), %vm742_vm1, %v739_v9  ;;  %585 = vmatprep.mubr.msk.bf16.mxu1 (!%p209_p10), %vm742_vm1, %v739_v9  ;;  %vm311_vm4 = vcmask (!%p209_p10), 1045504   ;;  %v293_v24 = vld [vmem:[%s917_s1] sm:$0xf] (!%p209_p10)  ;;  %vm307_vm5 = vcmask (!%p209_p10), 97280   ;;  %vm377_vm6 = vcmask (!%p209_p10), 1044448   ;;  %v387_v37 = vld [vmem:[%s920_s4 + $0x8] sm:$0xff] (!%p209_p10) }
  0x12   : > { %299 = vperm.xlu1 (!%p209_p10), %650, %v296_v15   ;;  %v386_v36 = vld [vmem:[%s920_s4] sm:$0xff] (!%p209_p10)  ;;  %vm414_vm7 = vcmask (!%p209_p10), 228352   ;;  %s235_s9 = sand.u32 (!%p209_p10), 1, %s719_s19  }
  0x13   : > { %v265_v8 = vsub.s32 (!%p209_p10), %v262_v6, %v264_v7  ;;  %v656_v47 = vld [vmem:[%s919_s3] sm:$0xff] (!%p209_p10)   ;;  %s557_s10 = sshll.u32 (!%p209_p10), %s235_s9, 3  ;;  %s467_s17 = scalar_lea.sflag (!%p209_p10), [#allocation7], %s235_s9 }
  0x16   : > { %s239_s7 = scalar_select %p238_p11, %s727_s21, 1  ;;  %v652_v10 = vld [vmem:[#allocation2] ss:$0 sps:$4 sm:$0xff]  }
  0x17   : > { %v266_v14 = vrot.slane %v652_v10, %v265_v8 }
  0x18   : > { %s558_s8 = sshll.u32 %s239_s7, 2 }
  0x19   : > { %s244_s11 = scalar_lea.vmem %s916_s0, %s558_s8  ;;  %267 = vrot.lane.b32.xlu0 %v266_v14, %s740_s12 }
  0x1a   : > { %v252_v1 = vld [vmem:[%s244_s11] sm:$0xf]  ;;  %s567_s11 = sshll.u32 %s727_s21, 7  ;;  %s743_s21 = smov [#allocation6]  }
  0x1b   : > { %v253_v5 = vpack.c.bf16 %v252_v1, %v252_v1  ;;  %s869_s16 = scalar_lea.hbm %s921_s5, %s567_s11  ;;  %s661_s25 = sshll.u32 %s743_s21, 4  ;;  %s662_s25 = int_to_ptr.vmem [resolvable:$false] %s661_s25 }
  0x1c   : > { %s663_s27 = scalar_lea.vmem %s662_s25, 256 }
  0x1d   : > { %254 = vst [vmem:[#allocation2 + $0x2] sm:$0x3] %v253_v5  ;;  %379 = vst [vmem:[#allocation5 + $0xc] sm:$0x3] %v253_v5 }
  0x24   : > { %v290_v11 = vld [vmem:[#allocation2 + $0x2] sm:$0x3] }
  0x25   : > { %v559_v12 = vld.sshfl [vmem:[#allocation2] sm:$0x33 pattern:$0x76325410] }
  0x26   : > { %v255_v13 = vld [vmem:[#allocation2 + $0x2] sm:$0x3]  ;;  %292 = vst.msk [vmem:[#allocation2] sm:$0x3] %vm291_vm0, %v290_v11  ;;  %283 = vrot.lane.b32.xlu0 %v559_v12, %s741_s13 }
  0x27   : > { %256 = vst [vmem:[#allocation4] sm:$0x3] %v255_v13 }
  0x8b   : > { %v268_v16 = vpop.permute.xlu0 %267 }
  0x8c   : > { %v269_v17 = vrot.slane %v268_v16, 4 }
  0x8e   : > { %v271_v18 = vsel %vm270_vm2, %v268_v16, %v269_v17 }
  0x8f   : > { %273 = vst [vmem:[#allocation4] sm:$0xc] %v271_v18 }
  0x91   : > { %v300_v25 = vpop.permute.xlu1 %299 }
  0x98   : > { %v284_v19 = vpop.permute.xlu0 %283 }
  0x99   : > { %v285_v20 = vrot.slane %v284_v19, 4 }
  0x9b   : > { %v287_v21 = vsel %vm286_vm3, %v284_v19, %v285_v20 }
  0x9c   : > { %289 = vst [vmem:[#allocation4 + $0x4] sm:$0x3] %v287_v21 }
  0xa3   : > { %v653_v22 = vld [vmem:[#allocation4] sm:$0x3f]  }
  0xa4   : > { %v313_v23 = vsel %vm311_vm4, %v653_v22, 0 }
  0xa5   : > { %576 = vmatpush3.bf16.msra.mxu0 %v313_v23 }
  0xa8   : > { %578 = vmatmul.mubr.msk.bf16.vlgmr.msra.gmra.mrb[0].mxu0 %vm307_vm5, %v293_v24 }
 0x17b   : > { %v349_v26 = vpop.f32.mrb[0].mxu0 }
 0x17c   : > { %v350_v27 = vadd.f32 %v349_v26, %v300_v25  ;;  %v579_v28 = vpop.f32.mrb[1].mxu0 }
 0x17d   : > { %v352_v29 = vpop.f32.mrb[2].mxu0 }
 0x17e   : > { %v355_v30 = vmax.f32 %v350_v27, 0.0  ;;  %v580_v31 = vpop.f32.mrb[3].mxu0 }
 0x180   : > { %v356_v32 = vpack.c.bf16 %v355_v30, %v355_v30 }
 0x182   : > { %357 = vst [vmem:[#allocation3 + $0x4] sm:$0xf] %v356_v32 }
 0x189   : > { %v358_v33 = vld [vmem:[#allocation3 + $0x4] sm:$0xf] }
 0x18a   : > { %v368_v34 = vld [vmem:[#allocation3] sm:$0xff]  ;;  %359 = vst [vmem:[#allocation5] sm:$0xf] %v358_v33 }
 0x18b   : > { %v376_v35 = vld [vmem:[#allocation3 + $0x4] sm:$0xf]  ;;  %370 = vrot.lane.b32.xlu0 %v368_v34, %s741_s13  ;;  %362 = vrot.lane.b32.xlu1 %v368_v34, %s740_s12  ;;  %s237_s12 = scalar_lea.vmem [#allocation6], %s557_s10 }
 0x18c   : > { %378 = vst.msk [vmem:[#allocation3] sm:$0xf] %vm377_vm6, %v376_v35  ;;  %s481_s13 = sshll.u32 %s237_s12, 4  ;;  %s871_s13 = int_to_ptr.vmem [resolvable:$true] %s481_s13 }
 0x18d   : > { %s657_s24 = scalar_lea.vmem %s871_s13, 128  ;;  %p664_p1 = scmp.lt.s32.totalorder %s871_s13, %s662_s25 }
 0x18e   : > { %p658_p12 = scmp.ne.s32.totalorder %s871_s13, %s657_s24  ;;  %p665_p2 = scmp.lt.s32.totalorder %s663_s27, %s657_s24 }
 0x18f   : > { %390 = vperm.xlu1 %650, %v386_v36   ;;  %395 = vperm.xlu0 %651, %v387_v37  }
 0x190   : > { %p659_p13 = pnand %p658_p12, %p814_p4  ;;  %p666_p3 = por %p665_p2, %p664_p1 }
 0x192   : > { %p660_p0 = pneg %p659_p13 }
 0x194   : > { %p667_p5 = pnand %p666_p3, %p660_p0 }
 0x1fd   : > { %v371_v38 = vpop.permute.xlu0 %370  ;;  %v363_v39 = vpop.permute.xlu1 %362 }
 0x1fe   : > { %v372_v40 = vrot.slane %v371_v38, 4  ;;  %v364_v41 = vrot.slane %v363_v39, 4 }
 0x200   : > { %v373_v42 = vsel %vm286_vm3, %v371_v38, %v372_v40  ;;  %v365_v43 = vsel %vm270_vm2, %v363_v39, %v364_v41 }
 0x201   : > { %375 = vst [vmem:[#allocation5 + $0x8] sm:$0xf] %v373_v42  ;;  %367 = vst [vmem:[#allocation5 + $0x4] sm:$0xf] %v365_v43 }
 0x208   : > { %v654_v44 = vld [vmem:[#allocation5] sm:$0xff]   ;;  %v655_v45 = vld [vmem:[#allocation5 + $0x8] sm:$0x3f]  }
 0x209   : > { %582 = vmatpush3.bf16.msra.mxu1 %v654_v44  ;;  %v419_v46 = vsel %vm311_vm4, %v655_v45, 0 }
 0x20a   : > { %583 = vmatprep.subr.bf16.mxu1 %v739_v9 }
 0x20d   : > { %584 = vmatpush3.bf16.msra.mxu1 %v419_v46 }
 0x20e   : > { %v391_v48 = vpop.permute.xlu1 %390  ;;  %v396_v50 = vpop.permute.xlu0 %395 }
 0x210   : > { %586 = vmatmul.mubr.msk.bf16.vlgmr.msra.gmra.mrb[0].mxu1 %vm414_vm7, %v656_v47 }
 0x2e3   : > { %v455_v49 = vpop.f32.mrb[0].mxu1 }
 0x2e4   : > { %v456_v51 = vadd.f32 %v455_v49, %v391_v48  ;;  %v587_v52 = vpop.f32.mrb[1].mxu1 }
 0x2e5   : > { %v458_v53 = vpop.f32.mrb[2].mxu1 }
 0x2e6   : > { %v462_v54 = vmax.f32 %v456_v51, 0.0  ;;  %v459_v55 = vadd.f32 %v458_v53, %v396_v50  ;;  %v588_v56 = vpop.f32.mrb[3].mxu1 }
 0x2e8   : > { %v463_v57 = vadd.f32 %v462_v54, %v459_v55 }
 0x2ea   : > { %v464_v58 = vmax.f32 %v463_v57, 0.0 }
 0x2ec   : > { %465 = vst [vmem:[%s237_s12] sm:$0xff] %v464_v58 }
 0x2ed   : > { %670 = shalt.err (!%p667_p5)
}
 0x2ee   : > { %s671_s29 = scalar_lea.hbm %s869_s16, 128  ;;  %s675_s9 = scalar_lea.hbm %s921_s5, 256 }
 0x2ef   : > { %p672_p6 = scmp.ne.s32.totalorder %s869_s16, %s671_s29  ;;  %p676_p10 = scmp.lt.u32.totalorder %s869_s16, %s921_s5 }
 0x2f0   : > { %p677_p11 = scmp.lt.u32.totalorder %s675_s9, %s671_s29  ;;  %p679_p13 = scmp.lt.u32.totalorder %s671_s29, %s869_s16 }
 0x2f1   : > { %p673_p7 = pnand %p672_p6, %p814_p4 }
 0x2f2   : > { %p678_p12 = por %p677_p11, %p676_p10 }
 0x2f3   : > { %p674_p9 = pneg %p673_p7 }
 0x2f4   : > { %p680_p0 = por %p679_p13, %p678_p12 }
 0x2f6   : > { %p681_p1 = pnand %p680_p0, %p674_p9 }
 0x2f8   : > { %684 = shalt.err (!%p681_p1)
}
 0x2f9   : > { %589 = dma.vmem_to_hbm [thread:$0]  (%p814_p4), %s871_s13, 128, %s869_s16, %s467_s17  }
 0x2fa PF: > { %p595_p2 = scmp.ge.s32.totalorder %s735_s23, 2  ;;  %s493_s12 = sand.u32 1, %s715_s18  }
 0x2fb   : > { %s494_s14 = scalar_lea.sflag [#allocation7], %s493_s12 }
 0x2fc   : > { %p592_p3 = pnand %p595_p2, %p821_p8 }
 0x2fe   : > { %710 = dma.done.wait (!%p592_p3), %s494_s14, 128  }
 0x2ff   : > { %712 = vsyncadd (!%p592_p3), %s494_s14, 4294967168  ;;  %s18_s23 = sadd.s32 1, %s735_s23   ;;  %s924_s18 = smov %s719_s19 }
 0x300   : > { %p15_p5 = scmp.ge.s32.totalorder %s18_s23, 4   ;;  %s925_s19 = smov %s723_s20 }
 0x301   : > { %s926_s20 = smov %s827_s6  ;;  %s927_s21 = smov %s731_s22 }
 0x302   : > { %s928_s22 = smov %s930_s26  ;;  %17 = sbr.rel (!%p15_p5) target bundleno = 4 (0x4), region = 79 }
 0x309   :  { %499 = vsyncpa [#allocation7], 1 }
 0x30a   :  { %501 = vsyncpa [#allocation7 + $0x1], 1 }

</bundles_post_ra>
